<compile_context>
chip_gen: v7x
topology: tpu7x:2x2x1
jax: 0.10.0
libtpu: 0.0.40
codegen_flags: <defaults>
</compile_context>

<pallas_src>
import functools

import jax
import jax.numpy as jnp
import numpy as np
from jax.experimental import pallas as pl
from jax.experimental.pallas import tpu as pltpu


# ----------------------------- configuration --------------------------------
D_IN = 8          # d_in
D_LATENT = 16     # d_latent
D_HIDDEN = 32     # resnet_cfg.d_hidden
D_OUT = 4         # d_out
N_BLOCKS = 3      # resnet_cfg.n_blocks
COMBINE_LAYER = 2 # resnet_cfg.combine_layer
BETA = 0.0        # resnet_cfg.beta  (<=0 -> ReLU, >0 -> Softplus(beta))

N_LIN_Z = min(COMBINE_LAYER, N_BLOCKS) if D_LATENT > 0 else 0
N_Z_REST = max(N_LIN_Z - 1, 0)            # latent injections not folded into lin_in
FEAT_W = N_BLOCKS * D_HIDDEN              # 96
PACKED_W = ((FEAT_W + D_OUT + 127) // 128) * 128   # 128: lane-dense output slab
OUT_PAD_W = PACKED_W - FEAT_W                       # 32: lin_out emitted at this width
assert OUT_PAD_W >= D_OUT

# Rows/step cap. Double-buffered IO at 4096 rows:
#   out 4096*128*4B*2 = 4 MiB, in 4096*24*4B*2 ~= 0.75 MiB, weights ~20 KiB
# -> ~5 MiB, well under the scoped-VMEM default (16 MiB v5e, 32 MiB v6e/v7x).
MAX_ROW_TILE = 4096


def _round_up(v, m):
    return ((v + m - 1) // m) * m


def _choose_row_tile(n):
    """Biggest tile that (a) amortizes per-step pipeline overhead, (b) keeps the
    grid >= 2 steps so the 'parallel' row axis shards across v7x's two TCs,
    (c) avoids large zero-padding waste for arbitrary N."""
    if n <= 8:
        return 8
    num_steps = max(2, pl.cdiv(n, MAX_ROW_TILE))
    tile = _round_up(pl.cdiv(n, num_steps), 8)
    return max(min(tile, MAX_ROW_TILE), 8)


def _activation(x, beta):
    """Matches nn.ReLU / nn.Softplus(beta) (threshold=20) semantics."""
    if beta > 0:
        bx = beta * x
        return jnp.where(bx > 20.0, x, jnp.log1p(jnp.exp(bx)) / beta)
    return jnp.maximum(x, 0.0)


# --------------------------------- kernel -----------------------------------
def resnet_fc_kernel(
    xz_ref,                      # (tile, d_in + d_latent) rows [x | z]
    w_in_ref, b_in_ref,          # fused lin_in (+ lin_z[0]) : (d_in+d_latent, d_hidden)
    wz_ref, bz_ref,              # remaining injections, x-rows zero-padded
    w0_ref, b0_ref,              # (n_blocks, d_hidden, d_hidden) / (n_blocks, 1, d_hidden)
    w1_ref, b1_ref,
    w_out_ref, b_out_ref,        # lin_out zero-padded to OUT_PAD_W columns
    packed_ref,                  # (tile, PACKED_W) lane-dense output slab
    *, n_blocks, combine_layer, d_hidden, n_z_rest, beta,
):
    act = functools.partial(_activation, beta=beta)

    xz = xz_ref[...]             # (tile, d_in + d_latent)

    # lin_in fused with the first latent injection: one K=(d_in+d_latent) matmul.
    h = jnp.dot(xz, w_in_ref[...], preferred_element_type=jnp.float32) + b_in_ref[...]

    # Remaining latent injections in a single matmul. The weight's x-rows are
    # zero, so it applies directly to [x|z] (no in-kernel lane slicing of xz).
    if n_z_rest > 0:
        tz = jnp.dot(xz, wz_ref[...], preferred_element_type=jnp.float32) + bz_ref[...]

    feats = []
    for blk in range(n_blocks):          # n_blocks is small & static -> unrolled
        if n_z_rest > 0 and 0 < blk < combine_layer:
            h = h + tz[:, (blk - 1) * d_hidden: blk * d_hidden]
        net = jnp.dot(act(h), w0_ref[blk], preferred_element_type=jnp.float32) + b0_ref[blk]
        dx = jnp.dot(act(net), w1_ref[blk], preferred_element_type=jnp.float32) + b1_ref[blk]
        h = h + dx                        # identity shortcut (size_in == size_out)
        feats.append(h)                   # kept in vregs; stored once at the end

    # lin_out at padded width so the slab is built from equal 32-lane pieces.
    out = jnp.dot(act(h), w_out_ref[...], preferred_element_type=jnp.float32) + b_out_ref[...]

    # Single lane-dense (tile, 128) store: [feat_0 | feat_1 | feat_2 | out+pad].
    packed_ref[...] = jnp.concatenate(feats + [out], axis=-1)


# -------------------------------- wrapper ------------------------------------
@jax.jit
def resnet_fc_forward(z, x, params):
    """z: (*batch, d_latent), x: (*batch, d_in) -> (output, features)."""
    batch_shape = x.shape[:-1]
    n = int(np.prod(batch_shape))
    x2 = x.reshape(n, D_IN).astype(jnp.float32)
    z2 = z.reshape(n, D_LATENT).astype(jnp.float32)

    tile = _choose_row_tile(n)
    n_pad = _round_up(n, tile)
    grid = (n_pad // tile,)

    # ---- one-time (tiny) weight fusions, fused into the jitted program ------
    if N_LIN_Z >= 1:
        # fold lin_z[0] into lin_in:  [x|z] @ [[W_in],[W_z0]] + (b_in + b_z0)
        w_in_f = jnp.concatenate([params["w_in"], params["wz"][0]], axis=0)
        b_in_f = params["b_in"] + params["bz"][0]
        xz = jnp.concatenate([x2, z2], axis=-1)
    else:
        w_in_f = params["w_in"]
        b_in_f = params["b_in"]
        xz = x2
    d_row = xz.shape[-1]

    if N_Z_REST > 0:
        wz_cat = jnp.concatenate([params["wz"][i] for i in range(1, N_LIN_Z)], axis=-1)
        wz_rest = jnp.concatenate(
            [jnp.zeros((D_IN, wz_cat.shape[-1]), jnp.float32), wz_cat], axis=0)
        bz_rest = jnp.concatenate([params["bz"][i] for i in range(1, N_LIN_Z)], axis=-1)
    else:  # unused dummy (static branch in the kernel never reads it)
        wz_rest = jnp.zeros((d_row, D_HIDDEN), jnp.float32)
        bz_rest = jnp.zeros((1, D_HIDDEN), jnp.float32)

    # lin_out zero-padded to OUT_PAD_W columns -> lane-dense 128-wide slab.
    w_out_p = jnp.zeros((D_HIDDEN, OUT_PAD_W), jnp.float32).at[:, :D_OUT].set(params["w_out"])
    b_out_p = jnp.zeros((1, OUT_PAD_W), jnp.float32).at[:, :D_OUT].set(params["b_out"])

    # ---- zero-pad rows to a multiple of the tile (arbitrary batch sizes) ----
    if n_pad != n:
        xz = jnp.pad(xz, ((0, n_pad - n), (0, 0)))

    kernel = functools.partial(
        resnet_fc_kernel,
        n_blocks=N_BLOCKS,
        combine_layer=COMBINE_LAYER,
        d_hidden=D_HIDDEN,
        n_z_rest=N_Z_REST,
        beta=BETA,
    )

    full2 = lambda a: pl.BlockSpec(a.shape, lambda i: (0, 0))
    full3 = lambda a: pl.BlockSpec(a.shape, lambda i: (0, 0, 0))

    packed = pl.pallas_call(
        kernel,
        out_shape=jax.ShapeDtypeStruct((n_pad, PACKED_W), jnp.float32),
        grid=grid,
        in_specs=[
            pl.BlockSpec((tile, d_row), lambda i: (i, 0)),   # [x|z] rows
            full2(w_in_f), full2(b_in_f),
            full2(wz_rest), full2(bz_rest),
            full3(params["w0"]), full3(params["b0"]),
            full3(params["w1"]), full3(params["b1"]),
            full2(w_out_p), full2(b_out_p),
        ],
        out_specs=pl.BlockSpec((tile, PACKED_W), lambda i: (i, 0)),
        compiler_params=pltpu.CompilerParams(dimension_semantics=("parallel",)),
    )(
        xz,
        w_in_f, b_in_f,
        wz_rest, bz_rest,
        params["w0"], params["b0"],
        params["w1"], params["b1"],
        w_out_p, b_out_p,
    )

    feats = packed[:n, :FEAT_W].reshape(*batch_shape, FEAT_W)
    out = packed[:n, FEAT_W:FEAT_W + D_OUT].reshape(*batch_shape, D_OUT)
    return out, feats


# -------------------------- pure-JAX reference --------------------------------
def resnet_fc_reference(z, x, params):
    """Unfused reference matching the PyTorch module's forward (compute_features=True)."""
    act = functools.partial(_activation, beta=BETA)
    h = x @ params["w_in"] + params["b_in"][0]
    feats = []
    for blk in range(N_BLOCKS):
        if D_LATENT > 0 and blk < COMBINE_LAYER:
            h = h + (z @ params["wz"][blk] + params["bz"][blk, 0])
        net = act(h) @ params["w0"][blk] + params["b0"][blk, 0]
        dx = act(net) @ params["w1"][blk] + params["b1"][blk, 0]
        h = h + dx
        feats.append(h)
    out = act(h) @ params["w_out"] + params["b_out"][0]
    return out, jnp.concatenate(feats, axis=-1)


# ----------------------------- param init -------------------------------------
def init_params(key):
    """Deterministic synthetic weights (kaiming-like fan_in normals).
    Weights are stored transposed vs. PyTorch: (d_in, d_out)."""
    ks = jax.random.split(key, 16)
    n_lin_z = max(N_LIN_Z, 1)

    def kaiming(k, fan_in, shape):
        return jax.random.normal(k, shape, jnp.float32) * jnp.sqrt(2.0 / fan_in)

    params = {
        "w_in": kaiming(ks[0], D_IN, (D_IN, D_HIDDEN)),
        "b_in": jnp.zeros((1, D_HIDDEN), jnp.float32),
        "wz": kaiming(ks[1], D_LATENT, (n_lin_z, D_LATENT, D_HIDDEN)),
        "bz": jnp.zeros((n_lin_z, 1, D_HIDDEN), jnp.float32),
        "w0": kaiming(ks[2], D_HIDDEN, (N_BLOCKS, D_HIDDEN, D_HIDDEN)),
        "b0": jnp.zeros((N_BLOCKS, 1, D_HIDDEN), jnp.float32),
        # NOTE: PyTorch inits fc_1.weight to zeros; we use nonzero values so the
        # residual path is actually exercised. Forward semantics are unchanged.
        "w1": kaiming(ks[3], D_HIDDEN, (N_BLOCKS, D_HIDDEN, D_HIDDEN)) * 0.1,
        "b1": jnp.zeros((N_BLOCKS, 1, D_HIDDEN), jnp.float32),
        "w_out": kaiming(ks[4], D_HIDDEN, (D_HIDDEN, D_OUT)),
        "b_out": jnp.zeros((1, D_OUT), jnp.float32),
    }
    return params


# ---------------------------------- main --------------------------------------
if __name__ == "__main__":
    key = jax.random.PRNGKey(0)
    k_p, k_x, k_z = jax.random.split(key, 3)

    params = init_params(k_p)

    # (*batch) = (camera=2, sample=60) -> 120 rows; not a tile multiple, so the
    # cdiv + row-padding path is exercised.
    x = jax.random.normal(k_x, (2, 60, D_IN), jnp.float32)
    z = jax.random.normal(k_z, (2, 60, D_LATENT), jnp.float32)

    out, feats = resnet_fc_forward(z, x, params)
    out = jax.block_until_ready(out)
    feats = jax.block_until_ready(feats)

    ref_out, ref_feats = resnet_fc_reference(
        z.reshape(-1, D_LATENT), x.reshape(-1, D_IN), params
    )
    np.testing.assert_allclose(
        np.asarray(out).reshape(-1, D_OUT), np.asarray(ref_out), rtol=1e-4, atol=1e-4
    )
    np.testing.assert_allclose(
        np.asarray(feats).reshape(-1, FEAT_W), np.asarray(ref_feats),
        rtol=1e-4, atol=1e-4,
    )

    print("KERNEL_OK")
</pallas_src>

<mosaic_0001>
module attributes {stable_mosaic.version = 11 : i64} {
  func.func @resnet_fc_kernel(%arg0: i32, %arg1: memref<64x24xf32, #tpu.memory_space<vmem>>, %arg2: memref<24x32xf32, #tpu.memory_space<vmem>>, %arg3: memref<1x32xf32, #tpu.memory_space<vmem>>, %arg4: memref<24x32xf32, #tpu.memory_space<vmem>>, %arg5: memref<1x32xf32, #tpu.memory_space<vmem>>, %arg6: memref<3x32x32xf32, #tpu.memory_space<vmem>>, %arg7: memref<3x1x32xf32, #tpu.memory_space<vmem>>, %arg8: memref<3x32x32xf32, #tpu.memory_space<vmem>>, %arg9: memref<3x1x32xf32, #tpu.memory_space<vmem>>, %arg10: memref<32x32xf32, #tpu.memory_space<vmem>>, %arg11: memref<1x32xf32, #tpu.memory_space<vmem>>, %arg12: memref<64x128xf32, #tpu.memory_space<vmem>>) attributes {dimension_semantics = [#tpu.dimension_semantics<parallel>], iteration_bounds = array<i64: 2>, scalar_prefetch = 0 : i64, scratch_operands = 0 : i64, tpu.core_type = #tpu.core_type<tc>, window_params = [{transform_indices = @transform_0, window_bounds = array<i64: 64, 24>}, {pipeline_mode = #tpu.pipeline_mode<synchronous>, transform_indices = @transform_1, window_bounds = array<i64: 24, 32>}, {pipeline_mode = #tpu.pipeline_mode<synchronous>, transform_indices = @transform_2, window_bounds = array<i64: 1, 32>}, {pipeline_mode = #tpu.pipeline_mode<synchronous>, transform_indices = @transform_3, window_bounds = array<i64: 24, 32>}, {pipeline_mode = #tpu.pipeline_mode<synchronous>, transform_indices = @transform_4, window_bounds = array<i64: 1, 32>}, {pipeline_mode = #tpu.pipeline_mode<synchronous>, transform_indices = @transform_5, window_bounds = array<i64: 3, 32, 32>}, {pipeline_mode = #tpu.pipeline_mode<synchronous>, transform_indices = @transform_6, window_bounds = array<i64: 3, 1, 32>}, {pipeline_mode = #tpu.pipeline_mode<synchronous>, transform_indices = @transform_7, window_bounds = array<i64: 3, 32, 32>}, {pipeline_mode = #tpu.pipeline_mode<synchronous>, transform_indices = @transform_8, window_bounds = array<i64: 3, 1, 32>}, {pipeline_mode = #tpu.pipeline_mode<synchronous>, transform_indices = @transform_9, window_bounds = array<i64: 32, 32>}, {pipeline_mode = #tpu.pipeline_mode<synchronous>, transform_indices = @transform_10, window_bounds = array<i64: 1, 32>}, {transform_indices = @transform_11, window_bounds = array<i64: 64, 128>}]} {
    %c0 = arith.constant 0 : index
    %c0_0 = arith.constant 0 : index
    %0 = vector.load %arg1[%c0, %c0_0] : memref<64x24xf32, #tpu.memory_space<vmem>>, vector<64x24xf32>
    %c0_1 = arith.constant 0 : index
    %c0_2 = arith.constant 0 : index
    %1 = vector.load %arg2[%c0_1, %c0_2] : memref<24x32xf32, #tpu.memory_space<vmem>>, vector<24x32xf32>
    %cst = arith.constant dense<0.000000e+00> : vector<64x32xf32>
    %2 = tpu.matmul %0, %1, %cst {dimension_numbers = #tpu.dot_dimension_numbers<[1], [0], [0], [1], [0, 0, 1, 1], [], []>} : vector<64x24xf32>, vector<24x32xf32>, vector<64x32xf32> -> vector<64x32xf32>
    %c0_3 = arith.constant 0 : index
    %c0_4 = arith.constant 0 : index
    %3 = vector.load %arg3[%c0_3, %c0_4] : memref<1x32xf32, #tpu.memory_space<vmem>>, vector<1x32xf32>
    %4 = vector.broadcast %3 : vector<1x32xf32> to vector<64x32xf32>
    %5 = arith.addf %2, %4 : vector<64x32xf32>
    %c0_5 = arith.constant 0 : index
    %c0_6 = arith.constant 0 : index
    %6 = vector.load %arg4[%c0_5, %c0_6] : memref<24x32xf32, #tpu.memory_space<vmem>>, vector<24x32xf32>
    %cst_7 = arith.constant dense<0.000000e+00> : vector<64x32xf32>
    %7 = tpu.matmul %0, %6, %cst_7 {dimension_numbers = #tpu.dot_dimension_numbers<[1], [0], [0], [1], [0, 0, 1, 1], [], []>} : vector<64x24xf32>, vector<24x32xf32>, vector<64x32xf32> -> vector<64x32xf32>
    %c0_8 = arith.constant 0 : index
    %c0_9 = arith.constant 0 : index
    %8 = vector.load %arg5[%c0_8, %c0_9] : memref<1x32xf32, #tpu.memory_space<vmem>>, vector<1x32xf32>
    %9 = vector.broadcast %8 : vector<1x32xf32> to vector<64x32xf32>
    %10 = arith.addf %7, %9 : vector<64x32xf32>
    %cst_10 = arith.constant 0.000000e+00 : f32
    %11 = vector.broadcast %cst_10 : f32 to vector<64x32xf32>
    %12 = arith.maximumf %5, %11 : vector<64x32xf32>
    %c0_11 = arith.constant 0 : index
    %c0_12 = arith.constant 0 : index
    %c0_13 = arith.constant 0 : index
    %13 = vector.load %arg6[%c0_11, %c0_12, %c0_13] : memref<3x32x32xf32, #tpu.memory_space<vmem>>, vector<1x32x32xf32>
    %14 = vector.shape_cast %13 : vector<1x32x32xf32> to vector<32x32xf32>
    %cst_14 = arith.constant dense<0.000000e+00> : vector<64x32xf32>
    %15 = tpu.matmul %12, %14, %cst_14 {dimension_numbers = #tpu.dot_dimension_numbers<[1], [0], [0], [1], [0, 0, 1, 1], [], []>} : vector<64x32xf32>, vector<32x32xf32>, vector<64x32xf32> -> vector<64x32xf32>
    %c0_15 = arith.constant 0 : index
    %c0_16 = arith.constant 0 : index
    %c0_17 = arith.constant 0 : index
    %16 = vector.load %arg7[%c0_15, %c0_16, %c0_17] : memref<3x1x32xf32, #tpu.memory_space<vmem>>, vector<1x1x32xf32>
    %17 = vector.shape_cast %16 : vector<1x1x32xf32> to vector<1x32xf32>
    %18 = vector.broadcast %17 : vector<1x32xf32> to vector<64x32xf32>
    %19 = arith.addf %15, %18 : vector<64x32xf32>
    %cst_18 = arith.constant 0.000000e+00 : f32
    %20 = vector.broadcast %cst_18 : f32 to vector<64x32xf32>
    %21 = arith.maximumf %19, %20 : vector<64x32xf32>
    %c0_19 = arith.constant 0 : index
    %c0_20 = arith.constant 0 : index
    %c0_21 = arith.constant 0 : index
    %22 = vector.load %arg8[%c0_19, %c0_20, %c0_21] : memref<3x32x32xf32, #tpu.memory_space<vmem>>, vector<1x32x32xf32>
    %23 = vector.shape_cast %22 : vector<1x32x32xf32> to vector<32x32xf32>
    %cst_22 = arith.constant dense<0.000000e+00> : vector<64x32xf32>
    %24 = tpu.matmul %21, %23, %cst_22 {dimension_numbers = #tpu.dot_dimension_numbers<[1], [0], [0], [1], [0, 0, 1, 1], [], []>} : vector<64x32xf32>, vector<32x32xf32>, vector<64x32xf32> -> vector<64x32xf32>
    %c0_23 = arith.constant 0 : index
    %c0_24 = arith.constant 0 : index
    %c0_25 = arith.constant 0 : index
    %25 = vector.load %arg9[%c0_23, %c0_24, %c0_25] : memref<3x1x32xf32, #tpu.memory_space<vmem>>, vector<1x1x32xf32>
    %26 = vector.shape_cast %25 : vector<1x1x32xf32> to vector<1x32xf32>
    %27 = vector.broadcast %26 : vector<1x32xf32> to vector<64x32xf32>
    %28 = arith.addf %24, %27 : vector<64x32xf32>
    %29 = arith.addf %5, %28 : vector<64x32xf32>
    %30 = arith.addf %29, %10 : vector<64x32xf32>
    %cst_26 = arith.constant 0.000000e+00 : f32
    %31 = vector.broadcast %cst_26 : f32 to vector<64x32xf32>
    %32 = arith.maximumf %30, %31 : vector<64x32xf32>
    %c1 = arith.constant 1 : index
    %c0_27 = arith.constant 0 : index
    %c0_28 = arith.constant 0 : index
    %33 = vector.load %arg6[%c1, %c0_27, %c0_28] : memref<3x32x32xf32, #tpu.memory_space<vmem>>, vector<1x32x32xf32>
    %34 = vector.shape_cast %33 : vector<1x32x32xf32> to vector<32x32xf32>
    %cst_29 = arith.constant dense<0.000000e+00> : vector<64x32xf32>
    %35 = tpu.matmul %32, %34, %cst_29 {dimension_numbers = #tpu.dot_dimension_numbers<[1], [0], [0], [1], [0, 0, 1, 1], [], []>} : vector<64x32xf32>, vector<32x32xf32>, vector<64x32xf32> -> vector<64x32xf32>
    %c1_30 = arith.constant 1 : index
    %c0_31 = arith.constant 0 : index
    %c0_32 = arith.constant 0 : index
    %36 = vector.load %arg7[%c1_30, %c0_31, %c0_32] : memref<3x1x32xf32, #tpu.memory_space<vmem>>, vector<1x1x32xf32>
    %37 = vector.shape_cast %36 : vector<1x1x32xf32> to vector<1x32xf32>
    %38 = vector.broadcast %37 : vector<1x32xf32> to vector<64x32xf32>
    %39 = arith.addf %35, %38 : vector<64x32xf32>
    %cst_33 = arith.constant 0.000000e+00 : f32
    %40 = vector.broadcast %cst_33 : f32 to vector<64x32xf32>
    %41 = arith.maximumf %39, %40 : vector<64x32xf32>
    %c1_34 = arith.constant 1 : index
    %c0_35 = arith.constant 0 : index
    %c0_36 = arith.constant 0 : index
    %42 = vector.load %arg8[%c1_34, %c0_35, %c0_36] : memref<3x32x32xf32, #tpu.memory_space<vmem>>, vector<1x32x32xf32>
    %43 = vector.shape_cast %42 : vector<1x32x32xf32> to vector<32x32xf32>
    %cst_37 = arith.constant dense<0.000000e+00> : vector<64x32xf32>
    %44 = tpu.matmul %41, %43, %cst_37 {dimension_numbers = #tpu.dot_dimension_numbers<[1], [0], [0], [1], [0, 0, 1, 1], [], []>} : vector<64x32xf32>, vector<32x32xf32>, vector<64x32xf32> -> vector<64x32xf32>
    %c1_38 = arith.constant 1 : index
    %c0_39 = arith.constant 0 : index
    %c0_40 = arith.constant 0 : index
    %45 = vector.load %arg9[%c1_38, %c0_39, %c0_40] : memref<3x1x32xf32, #tpu.memory_space<vmem>>, vector<1x1x32xf32>
    %46 = vector.shape_cast %45 : vector<1x1x32xf32> to vector<1x32xf32>
    %47 = vector.broadcast %46 : vector<1x32xf32> to vector<64x32xf32>
    %48 = arith.addf %44, %47 : vector<64x32xf32>
    %49 = arith.addf %30, %48 : vector<64x32xf32>
    %cst_41 = arith.constant 0.000000e+00 : f32
    %50 = vector.broadcast %cst_41 : f32 to vector<64x32xf32>
    %51 = arith.maximumf %49, %50 : vector<64x32xf32>
    %c2 = arith.constant 2 : index
    %c0_42 = arith.constant 0 : index
    %c0_43 = arith.constant 0 : index
    %52 = vector.load %arg6[%c2, %c0_42, %c0_43] : memref<3x32x32xf32, #tpu.memory_space<vmem>>, vector<1x32x32xf32>
    %53 = vector.shape_cast %52 : vector<1x32x32xf32> to vector<32x32xf32>
    %cst_44 = arith.constant dense<0.000000e+00> : vector<64x32xf32>
    %54 = tpu.matmul %51, %53, %cst_44 {dimension_numbers = #tpu.dot_dimension_numbers<[1], [0], [0], [1], [0, 0, 1, 1], [], []>} : vector<64x32xf32>, vector<32x32xf32>, vector<64x32xf32> -> vector<64x32xf32>
    %c2_45 = arith.constant 2 : index
    %c0_46 = arith.constant 0 : index
    %c0_47 = arith.constant 0 : index
    %55 = vector.load %arg7[%c2_45, %c0_46, %c0_47] : memref<3x1x32xf32, #tpu.memory_space<vmem>>, vector<1x1x32xf32>
    %56 = vector.shape_cast %55 : vector<1x1x32xf32> to vector<1x32xf32>
    %57 = vector.broadcast %56 : vector<1x32xf32> to vector<64x32xf32>
    %58 = arith.addf %54, %57 : vector<64x32xf32>
    %cst_48 = arith.constant 0.000000e+00 : f32
    %59 = vector.broadcast %cst_48 : f32 to vector<64x32xf32>
    %60 = arith.maximumf %58, %59 : vector<64x32xf32>
    %c2_49 = arith.constant 2 : index
    %c0_50 = arith.constant 0 : index
    %c0_51 = arith.constant 0 : index
    %61 = vector.load %arg8[%c2_49, %c0_50, %c0_51] : memref<3x32x32xf32, #tpu.memory_space<vmem>>, vector<1x32x32xf32>
    %62 = vector.shape_cast %61 : vector<1x32x32xf32> to vector<32x32xf32>
    %cst_52 = arith.constant dense<0.000000e+00> : vector<64x32xf32>
    %63 = tpu.matmul %60, %62, %cst_52 {dimension_numbers = #tpu.dot_dimension_numbers<[1], [0], [0], [1], [0, 0, 1, 1], [], []>} : vector<64x32xf32>, vector<32x32xf32>, vector<64x32xf32> -> vector<64x32xf32>
    %c2_53 = arith.constant 2 : index
    %c0_54 = arith.constant 0 : index
    %c0_55 = arith.constant 0 : index
    %64 = vector.load %arg9[%c2_53, %c0_54, %c0_55] : memref<3x1x32xf32, #tpu.memory_space<vmem>>, vector<1x1x32xf32>
    %65 = vector.shape_cast %64 : vector<1x1x32xf32> to vector<1x32xf32>
    %66 = vector.broadcast %65 : vector<1x32xf32> to vector<64x32xf32>
    %67 = arith.addf %63, %66 : vector<64x32xf32>
    %68 = arith.addf %49, %67 : vector<64x32xf32>
    %cst_56 = arith.constant 0.000000e+00 : f32
    %69 = vector.broadcast %cst_56 : f32 to vector<64x32xf32>
    %70 = arith.maximumf %68, %69 : vector<64x32xf32>
    %c0_57 = arith.constant 0 : index
    %c0_58 = arith.constant 0 : index
    %71 = vector.load %arg10[%c0_57, %c0_58] : memref<32x32xf32, #tpu.memory_space<vmem>>, vector<32x32xf32>
    %cst_59 = arith.constant dense<0.000000e+00> : vector<64x32xf32>
    %72 = tpu.matmul %70, %71, %cst_59 {dimension_numbers = #tpu.dot_dimension_numbers<[1], [0], [0], [1], [0, 0, 1, 1], [], []>} : vector<64x32xf32>, vector<32x32xf32>, vector<64x32xf32> -> vector<64x32xf32>
    %c0_60 = arith.constant 0 : index
    %c0_61 = arith.constant 0 : index
    %73 = vector.load %arg11[%c0_60, %c0_61] : memref<1x32xf32, #tpu.memory_space<vmem>>, vector<1x32xf32>
    %74 = vector.broadcast %73 : vector<1x32xf32> to vector<64x32xf32>
    %75 = arith.addf %72, %74 : vector<64x32xf32>
    %76 = tpu.concatenate %29, %49, %68, %75 in 1 : vector<64x32xf32>, vector<64x32xf32>, vector<64x32xf32>, vector<64x32xf32> -> vector<64x128xf32>
    %c0_62 = arith.constant 0 : index
    %c0_63 = arith.constant 0 : index
    %77 = vector.load %arg12[%c0_62, %c0_63] : memref<64x128xf32, #tpu.memory_space<vmem>>, vector<64x128xf32>
    tpu.vector_store %arg12[%c0_62, %c0_63], %76 {strides = array<i32>} : memref<64x128xf32, #tpu.memory_space<vmem>>, vector<64x128xf32>,
    return
  }
  func.func @transform_0(%arg0: i32) -> (i32, i32) {
    %c0_i32 = arith.constant 0 : i32
    %c0_i32_0 = arith.constant 0 : i32
    return %arg0, %c0_i32 : i32, i32
  }
  func.func @transform_1(%arg0: i32) -> (i32, i32) {
    %c0_i32 = arith.constant 0 : i32
    %c0_i32_0 = arith.constant 0 : i32
    %c0_i32_1 = arith.constant 0 : i32
    return %c0_i32, %c0_i32_0 : i32, i32
  }
  func.func @transform_2(%arg0: i32) -> (i32, i32) {
    %c0_i32 = arith.constant 0 : i32
    %c0_i32_0 = arith.constant 0 : i32
    %c0_i32_1 = arith.constant 0 : i32
    return %c0_i32, %c0_i32_0 : i32, i32
  }
  func.func @transform_3(%arg0: i32) -> (i32, i32) {
    %c0_i32 = arith.constant 0 : i32
    %c0_i32_0 = arith.constant 0 : i32
    %c0_i32_1 = arith.constant 0 : i32
    return %c0_i32, %c0_i32_0 : i32, i32
  }
  func.func @transform_4(%arg0: i32) -> (i32, i32) {
    %c0_i32 = arith.constant 0 : i32
    %c0_i32_0 = arith.constant 0 : i32
    %c0_i32_1 = arith.constant 0 : i32
    return %c0_i32, %c0_i32_0 : i32, i32
  }
  func.func @transform_5(%arg0: i32) -> (i32, i32, i32) {
    %c0_i32 = arith.constant 0 : i32
    %c0_i32_0 = arith.constant 0 : i32
    %c0_i32_1 = arith.constant 0 : i32
    %c0_i32_2 = arith.constant 0 : i32
    return %c0_i32, %c0_i32_0, %c0_i32_1 : i32, i32, i32
  }
  func.func @transform_6(%arg0: i32) -> (i32, i32, i32) {
    %c0_i32 = arith.constant 0 : i32
    %c0_i32_0 = arith.constant 0 : i32
    %c0_i32_1 = arith.constant 0 : i32
    %c0_i32_2 = arith.constant 0 : i32
    return %c0_i32, %c0_i32_0, %c0_i32_1 : i32, i32, i32
  }
  func.func @transform_7(%arg0: i32) -> (i32, i32, i32) {
    %c0_i32 = arith.constant 0 : i32
    %c0_i32_0 = arith.constant 0 : i32
    %c0_i32_1 = arith.constant 0 : i32
    %c0_i32_2 = arith.constant 0 : i32
    return %c0_i32, %c0_i32_0, %c0_i32_1 : i32, i32, i32
  }
  func.func @transform_8(%arg0: i32) -> (i32, i32, i32) {
    %c0_i32 = arith.constant 0 : i32
    %c0_i32_0 = arith.constant 0 : i32
    %c0_i32_1 = arith.constant 0 : i32
    %c0_i32_2 = arith.constant 0 : i32
    return %c0_i32, %c0_i32_0, %c0_i32_1 : i32, i32, i32
  }
  func.func @transform_9(%arg0: i32) -> (i32, i32) {
    %c0_i32 = arith.constant 0 : i32
    %c0_i32_0 = arith.constant 0 : i32
    %c0_i32_1 = arith.constant 0 : i32
    return %c0_i32, %c0_i32_0 : i32, i32
  }
  func.func @transform_10(%arg0: i32) -> (i32, i32) {
    %c0_i32 = arith.constant 0 : i32
    %c0_i32_0 = arith.constant 0 : i32
    %c0_i32_1 = arith.constant 0 : i32
    return %c0_i32, %c0_i32_0 : i32, i32
  }
  func.func @transform_11(%arg0: i32) -> (i32, i32) {
    %c0_i32 = arith.constant 0 : i32
    %c0_i32_0 = arith.constant 0 : i32
    return %arg0, %c0_i32 : i32, i32
  }
}

</mosaic_0001>

<bundles_post_ra>
// kernel: resnet_fc_forward.1
= control target key start
LH: loop header
LB: loop body
LE: loop exit
PB: predicated region body
PF: predicated region fallthrough
CT: control target
= control target key end

     0   :  { %s2460_s17 = smov 0   ;;  %s2895_s0 = inlined_call_operand.vmem [shape: f32[128,24], index: 0, kind: input, shape index: {}]   ;;  %s2896_s1 = inlined_call_operand.vmem [shape: f32[24,32], index: 1, kind: input, shape index: {}]   ;;  %s2897_s2 = inlined_call_operand.vmem [shape: f32[1,32], index: 2, kind: input, shape index: {}]   ;;  %s2898_s3 = inlined_call_operand.vmem [shape: f32[24,32], index: 3, kind: input, shape index: {}]   ;;  %s2899_s4 = inlined_call_operand.vmem [shape: f32[1,32], index: 4, kind: input, shape index: {}]   ;;  %s2900_s5 = inlined_call_operand.vmem [shape: f32[3,32,32], index: 5, kind: input, shape index: {}]   ;;  %s2901_s6 = inlined_call_operand.vmem [shape: f32[3,1,32], index: 6, kind: input, shape index: {}]   ;;  %s2902_s7 = inlined_call_operand.vmem [shape: f32[3,32,32], index: 7, kind: input, shape index: {}]   ;;  %s2903_s8 = inlined_call_operand.vmem [shape: f32[3,1,32], index: 8, kind: input, shape index: {}]   ;;  %s2904_s9 = inlined_call_operand.vmem [shape: f32[32,32], index: 9, kind: input, shape index: {}]   ;;  %s2905_s10 = inlined_call_operand.vmem [shape: f32[1,32], index: 10, kind: input, shape index: {}]   ;;  %s2906_s11 = inlined_call_operand.vmem [shape: f32[128,128], index: 11, kind: output, shape index: {}]  }
   0x1 LB: > { %s1916_s18 = sadd.s32 4294967295, %s2395_s17   ;;  %p1920_p0 = scmp.ge.s32.totalorder %s2395_s17, 1  ;;  %s2395_s17 = sphi %s2460_s17, %s21_s17  }
   0x2   : > { %p338_p1 = scmp.lt.s32.totalorder %s2395_s17, 3 }
   0x4   : > { %p339_p2 = pnand %p1920_p0, %p338_p1 }
   0x5   : > { %v398_v0 = vld [vmem:[%s2896_s1] sm:$0xff] (!%p339_p2)  ;;  %v399_v1 = vld [vmem:[%s2896_s1 + $0x8] sm:$0xff] (!%p339_p2)  ;;  %s1921_s23 = sshll.u32 (!%p339_p2), %s1916_s18, 3  ;;  %v400_v3 = vld [vmem:[%s2896_s1 + $0x10] sm:$0xff] (!%p339_p2)  ;;  %vm408_vm0 = vcmask (!%p339_p2), 195584   ;;  %vm672_vm1 = vcmask (!%p339_p2), 261120  }
   0x6   : > { %342 = sbr.rel (%p339_p2) target bundleno = 1897 (0x769), region = 64  ;;  %v2310_v2 = vpack.c.bf16 (!%p339_p2), %v399_v1, %v398_v0  ;;  %p379_p3 = scmp.lt.s32.totalorder (!%p339_p2), %s1921_s23, 15  ;;  %v661_v4 = vld [vmem:[%s2900_s5] sm:$0xff] (!%p339_p2)  ;;  %v662_v5 = vld [vmem:[%s2900_s5 + $0x8] sm:$0xff] (!%p339_p2)  ;;  %v663_v15 = vld [vmem:[%s2900_s5 + $0x10] sm:$0xff] (!%p339_p2)  ;;  %vm1834_vm2 = vcmask (!%p339_p2), 523264  }
   0x7   : > { %v2318_v9 = vpack.c.bf16 (!%p339_p2), %v662_v5, %v661_v4  ;;  %v664_v16 = vld [vmem:[%s2900_s5 + $0x18] sm:$0xff] (!%p339_p2)  ;;  %v538_v18 = vld [vmem:[%s2898_s3] sm:$0xff] (!%p339_p2)  ;;  %v539_v19 = vld [vmem:[%s2898_s3 + $0x8] sm:$0xff] (!%p339_p2)  ;;  %s2397_s22 = smov (!%p339_p2), 32   ;;  %s2398_s28 = smov (!%p339_p2), 64   ;;  %vm1843_vm3 = vcmask (!%p339_p2), 785408  }
   0x8   : > { %2311 = vmatprep.subr.bf16.mxu0 (!%p339_p2), %v2310_v2  ;;  %2374 = vmatprep.subr.bf16.mxu1 (!%p339_p2), %v2310_v2  ;;  %v2322_v17 = vpack.c.bf16 (!%p339_p2), %v664_v16, %v663_v15  ;;  %v2314_v20 = vpack.c.bf16 (!%p339_p2), %v539_v19, %v538_v18  ;;  %v540_v21 = vld [vmem:[%s2898_s3 + $0x10] sm:$0xff] (!%p339_p2)  ;;  %v810_v22 = vld [vmem:[%s2902_s7] sm:$0xff] (!%p339_p2)  ;;  %v811_v23 = vld [vmem:[%s2902_s7 + $0x8] sm:$0xff] (!%p339_p2)  ;;  %s2399_s13 = smov (!%p339_p2), 96  }
   0x9   : > { %2313 = vmatpush3.bf16.msra.mxu0 (!%p339_p2), %v2310_v2  ;;  %2376 = vmatpush3.bf16.msra.mxu1 (!%p339_p2), %v2310_v2  ;;  %v812_v24 = vld [vmem:[%s2902_s7 + $0x10] sm:$0xff] (!%p339_p2)  ;;  %v813_v25 = vld [vmem:[%s2902_s7 + $0x18] sm:$0xff] (!%p339_p2)  ;;  %v2326_v26 = vpack.c.bf16 (!%p339_p2), %v811_v23, %v810_v22  ;;  %v1925_v28 = vld [vmem:[%s2897_s2] ss:$0 sm:$0xff] (!%p339_p2) }
   0xa   : > { %2138 = vmatprep.subr.mxu0 (!%p339_p2), %v400_v3  ;;  %2375 = vmatprep.subr.mxu1 (!%p339_p2), %v400_v3  ;;  %v2330_v27 = vpack.c.bf16 (!%p339_p2), %v813_v25, %v812_v24  ;;  %v1961_v53 = vld [vmem:[%s2900_s5 + $0x20] sm:$0xff] (!%p339_p2)  ;;  %v1962_v54 = vld [vmem:[%s2900_s5 + $0x28] sm:$0xff] (!%p339_p2)  ;;  %v1963_v25 = vld [vmem:[%s2900_s5 + $0x30] sm:$0xff] (!%p339_p2) }
   0xb   : > { %v2334_v55 = vpack.c.bf16 (!%p339_p2), %v1962_v54, %v1961_v53  ;;  %v1943_v0 = vld [vmem:[%s2901_s6] ss:$0 sm:$0xff] (!%p339_p2) }
   0xd   : > { %s2908_s23 = smov (!%p379_p3, %s1921_s23), 15  ;;  %2139 = vmatpush3.msra.mxu0 %v400_v3  ;;  %2377 = vmatpush3.msra.mxu1 %v400_v3 }
   0xe   : > { %s1922_s30 = sshll.u32 %s2908_s23, 3  ;;  %2319 = vmatprep.subr.bf16.mxu0 %v2318_v9  ;;  %2315 = vmatprep.subr.bf16.mxu1 %v2314_v20 }
   0xf   : > { %s382_s14 = scalar_lea.vmem %s2895_s0, %s1922_s30  ;;  %s2850_s16 = scalar_lea.vmem %s2906_s11, %s1922_s30 }
  0x10   : > { %v390_v6 = vld [vmem:[%s382_s14] sm:$0xff]  ;;  %v391_v7 = vld [vmem:[%s382_s14 + $0x8] sm:$0xff]  ;;  %v392_v8 = vld [vmem:[%s382_s14 + $0x10] sm:$0xff] }
  0x11   : > { %2140 = vmatprep.mubr.msk.f32.mxu0 %vm408_vm0, %v390_v6  ;;  %v394_v10 = vld [vmem:[%s382_s14 + $0x20] sm:$0xff]  ;;  %v395_v11 = vld [vmem:[%s382_s14 + $0x28] sm:$0xff]  ;;  %v396_v12 = vld [vmem:[%s382_s14 + $0x30] sm:$0xff] }
  0x12   : > { %2141 = vmatmul.mubr.msk.f32.vlgmr.msra.gmra.mrb[0].mxu0 %vm408_vm0, %v391_v7  ;;  %v393_v13 = vld [vmem:[%s382_s14 + $0x18] sm:$0xff]  ;;  %2146 = vmatprep.mubr.msk.f32.mxu1 %vm408_vm0, %v394_v10 }
  0x13   : > { %2143 = vmatprep.mubr.msk.f32.mxu0 %vm408_vm0, %v392_v8  ;;  %2147 = vmatmul.mubr.msk.f32.vlgmr.msra.gmra.mrb[0].mxu1 %vm408_vm0, %v395_v11  ;;  %v397_v14 = vld [vmem:[%s382_s14 + $0x38] sm:$0xff] }
  0x14   : > { %2149 = vmatprep.mubr.msk.f32.mxu1 %vm408_vm0, %v396_v12  ;;  %2321 = vmatpush3.bf16.msra.mxu0 %v2318_v9 }
  0x15   : > { %2323 = vmatprep.subr.bf16.mxu0 %v2322_v17  ;;  %2317 = vmatpush3.bf16.msra.mxu1 %v2314_v20 }
  0x16   : > { %2144 = vmatmul.mubr.msk.f32.gmra.mrb[2].mxu0 %vm408_vm0, %v393_v13  ;;  %2156 = vmatprep.subr.mxu1 %v540_v21 }
  0x17   : > { %2150 = vmatmul.mubr.msk.f32.gmra.mrb[2].mxu1 %vm408_vm0, %v397_v14 }
  0x18   : > { %2158 = vmatprep.mubr.msk.f32.mxu1 %vm408_vm0, %v390_v6  ;;  %2325 = vmatpush3.bf16.msra.mxu0 %v2322_v17 }
  0x19   : > { %2157 = vmatpush3.msra.mxu1 %v540_v21  ;;  %2335 = vmatprep.subr.bf16.mxu0 %v2334_v55 }
  0x1a   : > { %2327 = vmatprep.subr.bf16.mxu1 %v2326_v26 }
  0x1b   : > { %2159 = vmatmul.mubr.msk.f32.vlgmr.msra.gmra.mrb[4].mxu1 %vm408_vm0, %v391_v7 }
  0x1c   : > { %2329 = vmatpush3.bf16.msra.mxu1 %v2326_v26  ;;  %2161 = vmatprep.mubr.msk.f32.mxu1 %vm408_vm0, %v392_v8  ;;  %v1964_v26 = vld [vmem:[%s2900_s5 + $0x38] sm:$0xff] }
  0x1d   : > { %2331 = vmatprep.subr.bf16.mxu1 %v2330_v27 }
  0x1f   : > { %2162 = vmatmul.mubr.msk.f32.gmra.mrb[6].mxu1 %vm408_vm0, %v393_v13 }
  0x20   : > { %2164 = vmatprep.mubr.msk.f32.mxu1 %vm408_vm0, %v394_v10  ;;  %2333 = vmatpush3.bf16.msra.mxu1 %v2330_v27  ;;  %v2338_v27 = vpack.c.bf16 %v1964_v26, %v1963_v25 }
  0x23   : > { %2165 = vmatmul.mubr.msk.f32.gmra.mrb[8].mxu1 %vm408_vm0, %v395_v11 }
  0x24   : > { %2167 = vmatprep.mubr.msk.f32.mxu1 %vm408_vm0, %v396_v12 }
  0x27   : > { %2168 = vmatmul.mubr.msk.f32.gmra.mrb[10].mxu1 %vm408_vm0, %v397_v14 }
  0xe5   : > { %v2142_v29 = vpop.f32.mrb[0].mxu0 }
  0xe6   : > { %v2537_v30 = vadd.f32 %v2142_v29, %v1925_v28  ;;  %v499_v31 = vpop.f32.mrb[1].mxu0  ;;  %v2148_v33 = vpop.f32.mrb[0].mxu1  ;;  %v1976_v29 = vld [vmem:[%s2902_s7 + $0x28] sm:$0xff] }
  0xe7   : > { %v2539_v32 = vadd.f32 %v1925_v28, %v499_v31  ;;  %v519_v34 = vpop.f32.mrb[1].mxu1  ;;  %v2556_v48 = vadd.f32 %v2148_v33, %v1925_v28  ;;  %v1977_v31 = vld [vmem:[%s2902_s7 + $0x30] sm:$0xff] }
  0xe8   : > { %v2542_v37 = vadd.f32 %v1925_v28, %v519_v34  ;;  %v654_v38 = vmax.f32 %v2537_v30, 0.0  ;;  %v1978_v34 = vld [vmem:[%s2902_s7 + $0x38] sm:$0xff] }
  0xe9   : > { %v653_v35 = vmax.f32 %v2539_v32, 0.0  ;;  %v2145_v36 = vpop.f32.mrb[2].mxu0  ;;  %v658_v50 = vmax.f32 %v2556_v48, 0.0 }
  0xea   : > { %v2545_v39 = vadd.f32 %v2145_v36, %v1925_v28  ;;  %v509_v40 = vpop.f32.mrb[3].mxu0  ;;  %v2151_v42 = vpop.f32.mrb[2].mxu1  ;;  %v657_v45 = vmax.f32 %v2542_v37, 0.0  ;;  %v1952_v36 = vld [vmem:[%s2903_s8] ss:$0 sm:$0xff] }
  0xeb   : > { %v2547_v41 = vadd.f32 %v1925_v28, %v509_v40  ;;  %2178 = vmatprep.mubr.msk.f32.mxu0 %vm672_vm1, %v653_v35  ;;  %v529_v43 = vpop.f32.mrb[3].mxu1  ;;  %v2563_v51 = vadd.f32 %v2151_v42, %v1925_v28  ;;  %v2346_v35 = vpack.c.bf16 %v1978_v34, %v1977_v31 }
  0xec   : > { %2179 = vmatmul.mubr.msk.f32.vlgmr.msra.gmra.mrb[4].mxu0 %vm672_vm1, %v654_v38  ;;  %v2553_v46 = vadd.f32 %v1925_v28, %v529_v43  ;;  %v656_v47 = vmax.f32 %v2545_v39, 0.0  ;;  %v1975_v28 = vld [vmem:[%s2902_s7 + $0x20] sm:$0xff] }
  0xed   : > { %v655_v44 = vmax.f32 %v2547_v41, 0.0  ;;  %v660_v52 = vmax.f32 %v2563_v51, 0.0  ;;  %2337 = vmatpush3.bf16.msra.mxu0 %v2334_v55  ;;  %v2342_v33 = vpack.c.bf16 %v1976_v29, %v1975_v28  ;;  %v1934_v38 = vld [vmem:[%s2899_s4] ss:$0 sm:$0xff] }
  0xee   : > { %v659_v49 = vmax.f32 %v2553_v46, 0.0  ;;  %v2575_v56 = vpop.f32.mrb[4].mxu1  ;;  %2339 = vmatprep.subr.bf16.mxu0 %v2338_v27 }
  0xef   : > { %2181 = vmatprep.mubr.msk.f32.mxu0 %vm672_vm1, %v655_v44  ;;  %v2577_v57 = vpop.f32.mrb[5].mxu1  ;;  %2343 = vmatprep.subr.bf16.mxu1 %v2342_v33 }
  0xf0   : > { %2182 = vmatmul.mubr.msk.f32.gmra.mrb[6].mxu0 %vm672_vm1, %v656_v47 }
  0xf1   : > { %2184 = vmatprep.mubr.msk.f32.mxu0 %vm672_vm1, %v657_v45  ;;  %2341 = vmatpush3.bf16.msra.mxu0 %v2338_v27  ;;  %v620_v45 = vadd.f32 %v2575_v56, %v1934_v38 }
  0xf2   : > { %v2579_v58 = vpop.f32.mrb[6].mxu1 }
  0xf3   : > { %v2581_v59 = vpop.f32.mrb[7].mxu1  ;;  %v630_v56 = vadd.f32 %v2579_v58, %v1934_v38 }
  0xf4   : > { %2185 = vmatmul.mubr.msk.f32.gmra.mrb[8].mxu0 %vm672_vm1, %v658_v50 }
  0xf5   : > { %2187 = vmatprep.mubr.msk.f32.mxu0 %vm672_vm1, %v659_v49  ;;  %v615_v49 = vadd.f32 %v1934_v38, %v2577_v57  ;;  %v625_v57 = vadd.f32 %v1934_v38, %v2581_v59 }
  0xf6   : > { %v2583_v60 = vpop.f32.mrb[8].mxu1 }
  0xf7   : > { %v2585_v61 = vpop.f32.mrb[9].mxu1  ;;  %v640_v59 = vadd.f32 %v2583_v60, %v1934_v38 }
  0xf8   : > { %2188 = vmatmul.mubr.msk.f32.gmra.mrb[10].mxu0 %vm672_vm1, %v660_v52 }
  0xfa   : > { %v2587_v62 = vpop.f32.mrb[10].mxu1 }
  0xfb   : > { %v2589_v63 = vpop.f32.mrb[11].mxu1 }
 0x1bf   : > { %v2180_v1 = vpop.f32.mrb[4].mxu0 }
 0x1c0   : > { %v769_v2 = vadd.f32 %v2180_v1, %v1943_v0  ;;  %v763_v3 = vpop.f32.mrb[5].mxu0 }
 0x1c1   : > { %v764_v4 = vadd.f32 %v1943_v0, %v763_v3 }
 0x1c2   : > { %v803_v7 = vmax.f32 %v769_v2, 0.0 }
 0x1c3   : > { %v802_v5 = vmax.f32 %v764_v4, 0.0  ;;  %v2183_v6 = vpop.f32.mrb[6].mxu0 }
 0x1c4   : > { %v779_v8 = vadd.f32 %v2183_v6, %v1943_v0  ;;  %v773_v9 = vpop.f32.mrb[7].mxu0 }
 0x1c5   : > { %v774_v10 = vadd.f32 %v1943_v0, %v773_v9  ;;  %2198 = vmatprep.mubr.msk.f32.mxu1 %vm672_vm1, %v802_v5 }
 0x1c6   : > { %2199 = vmatmul.mubr.msk.f32.vlgmr.msra.gmra.mrb[12].mxu1 %vm672_vm1, %v803_v7  ;;  %v805_v13 = vmax.f32 %v779_v8, 0.0 }
 0x1c7   : > { %v804_v11 = vmax.f32 %v774_v10, 0.0  ;;  %v2186_v12 = vpop.f32.mrb[8].mxu0  ;;  %2345 = vmatpush3.bf16.msra.mxu1 %v2342_v33 }
 0x1c8   : > { %v789_v14 = vadd.f32 %v2186_v12, %v1943_v0  ;;  %v783_v15 = vpop.f32.mrb[9].mxu0  ;;  %2347 = vmatprep.subr.bf16.mxu1 %v2346_v35 }
 0x1c9   : > { %v784_v16 = vadd.f32 %v1943_v0, %v783_v15  ;;  %2201 = vmatprep.mubr.msk.f32.mxu1 %vm672_vm1, %v804_v11 }
 0x1ca   : > { %2202 = vmatmul.mubr.msk.f32.gmra.mrb[14].mxu1 %vm672_vm1, %v805_v13  ;;  %v807_v19 = vmax.f32 %v789_v14, 0.0 }
 0x1cb   : > { %v806_v17 = vmax.f32 %v784_v16, 0.0  ;;  %v2189_v18 = vpop.f32.mrb[10].mxu0  ;;  %2349 = vmatpush3.bf16.msra.mxu1 %v2346_v35 }
 0x1cc   : > { %v799_v20 = vadd.f32 %v2189_v18, %v1943_v0  ;;  %v793_v21 = vpop.f32.mrb[11].mxu0 }
 0x1cd   : > { %v794_v22 = vadd.f32 %v1943_v0, %v793_v21  ;;  %2204 = vmatprep.mubr.msk.f32.mxu1 %vm672_vm1, %v806_v17 }
 0x1ce   : > { %2205 = vmatmul.mubr.msk.f32.gmra.mrb[16].mxu1 %vm672_vm1, %v807_v19  ;;  %v809_v24 = vmax.f32 %v799_v20, 0.0 }
 0x1cf   : > { %v808_v23 = vmax.f32 %v794_v22, 0.0 }
 0x1d1   : > { %2207 = vmatprep.mubr.msk.f32.mxu1 %vm672_vm1, %v808_v23  ;;  %v1966_v23 = vld [vmem:[%s2901_s6 + $0x1] ss:$0 sm:$0xff] }
 0x1d2   : > { %2208 = vmatmul.mubr.msk.f32.gmra.mrb[18].mxu1 %vm672_vm1, %v809_v24 }
 0x299   : > { %v2200_v40 = vpop.f32.mrb[12].mxu1 }
 0x29a   : > { %v917_v42 = vadd.f32 %v2200_v40, %v1952_v36  ;;  %v911_v43 = vpop.f32.mrb[13].mxu1 }
 0x29b   : > { %v912_v44 = vadd.f32 %v1952_v36, %v911_v43 }
 0x29c   : > { %v2628_v47 = vadd.f32 %v917_v42, %v2537_v30 }
 0x29d   : > { %v2632_v50 = vadd.f32 %v912_v44, %v2539_v32  ;;  %v2203_v52 = vpop.f32.mrb[14].mxu1 }
 0x29e   : > { %v2635_v53 = vadd.f32 %v2628_v47, %v620_v45  ;;  %v927_v54 = vadd.f32 %v2203_v52, %v1952_v36  ;;  %v921_v55 = vpop.f32.mrb[15].mxu1 }
 0x29f   : > { %v2638_v0 = vadd.f32 %v2632_v50, %v615_v49  ;;  %v922_v1 = vadd.f32 %v1952_v36, %v921_v55 }
 0x2a0   : > { %v2642_v30 = vadd.f32 %v927_v54, %v2545_v39  ;;  %v967_v4 = vmax.f32 %v2635_v53, 0.0 }
 0x2a1   : > { %v966_v32 = vmax.f32 %v2638_v0, 0.0  ;;  %v2647_v2 = vadd.f32 %v922_v1, %v2547_v41  ;;  %v2206_v3 = vpop.f32.mrb[16].mxu1  ;;  %v635_v41 = vadd.f32 %v1934_v38, %v2585_v61  ;;  %v650_v61 = vadd.f32 %v2587_v62, %v1934_v38 }
 0x2a2   : > { %v2651_v5 = vadd.f32 %v2642_v30, %v630_v56  ;;  %v937_v6 = vadd.f32 %v2206_v3, %v1952_v36  ;;  %v931_v7 = vpop.f32.mrb[17].mxu1  ;;  %v1992_v3 = vld [vmem:[%s2900_s5 + $0x58] sm:$0xff] }
 0x2a3   : > { %v2654_v58 = vadd.f32 %v2647_v2, %v625_v57  ;;  %v932_v39 = vadd.f32 %v1952_v36, %v931_v7  ;;  %2218 = vmatprep.mubr.msk.f32.mxu0 %vm672_vm1, %v966_v32  ;;  %v1991_v32 = vld [vmem:[%s2900_s5 + $0x50] sm:$0xff] }
 0x2a4   : > { %v2659_v8 = vadd.f32 %v937_v6, %v2556_v48  ;;  %2219 = vmatmul.mubr.msk.f32.vlgmr.msra.gmra.mrb[12].mxu0 %vm672_vm1, %v967_v4  ;;  %v969_v12 = vmax.f32 %v2651_v5, 0.0  ;;  %v2354_v4 = vpack.c.bf16 %v1992_v3, %v1991_v32  ;;  %v1980_v6 = vld [vmem:[%s2903_s8 + $0x1] ss:$0 sm:$0xff] }
 0x2a5   : > { %v968_v9 = vmax.f32 %v2654_v58, 0.0  ;;  %v2665_v10 = vadd.f32 %v932_v39, %v2542_v37  ;;  %v2209_v11 = vpop.f32.mrb[18].mxu1  ;;  %v645_v37 = vadd.f32 %v1934_v38, %v2589_v63  ;;  %v1990_v63 = vld [vmem:[%s2900_s5 + $0x48] sm:$0xff] }
 0x2a6   : > { %v2669_v13 = vadd.f32 %v2659_v8, %v640_v59  ;;  %v947_v14 = vadd.f32 %v2209_v11, %v1952_v36  ;;  %v941_v60 = vpop.f32.mrb[19].mxu1 }
 0x2a7   : > { %v2672_v48 = vadd.f32 %v2665_v10, %v635_v41  ;;  %v942_v15 = vadd.f32 %v1952_v36, %v941_v60  ;;  %2221 = vmatprep.mubr.msk.f32.mxu0 %vm672_vm1, %v968_v9 }
 0x2a8   : > { %v2677_v16 = vadd.f32 %v947_v14, %v2563_v51  ;;  %2222 = vmatmul.mubr.msk.f32.gmra.mrb[14].mxu0 %vm672_vm1, %v969_v12  ;;  %v971_v19 = vmax.f32 %v2669_v13, 0.0 }
 0x2a9   : > { %v970_v17 = vmax.f32 %v2672_v48, 0.0  ;;  %v2683_v18 = vadd.f32 %v942_v15, %v2553_v46  ;;  %v1989_v46 = vld [vmem:[%s2900_s5 + $0x40] sm:$0xff] }
 0x2aa   : > { %v2687_v20 = vadd.f32 %v2677_v16, %v650_v61  ;;  %v2350_v22 = vpack.c.bf16 %v1990_v63, %v1989_v46  ;;  %v2006_v63 = vld [vmem:[%s2902_s7 + $0x58] sm:$0xff] }
 0x2ab   : > { %v2690_v21 = vadd.f32 %v2683_v18, %v645_v37  ;;  %2224 = vmatprep.mubr.msk.f32.mxu0 %vm672_vm1, %v970_v17 }
 0x2ac   : > { %2225 = vmatmul.mubr.msk.f32.gmra.mrb[16].mxu0 %vm672_vm1, %v971_v19  ;;  %v973_v62 = vmax.f32 %v2687_v20, 0.0  ;;  %2351 = vmatprep.subr.bf16.mxu0 %v2350_v22  ;;  %v2003_v19 = vld [vmem:[%s2902_s7 + $0x40] sm:$0xff] }
 0x2ad   : > { %v972_v51 = vmax.f32 %v2690_v21, 0.0  ;;  %2353 = vmatpush3.bf16.msra.mxu0 %v2350_v22 }
 0x2ae   : > { %2355 = vmatprep.subr.bf16.mxu0 %v2354_v4 }
 0x2af   : > { %2227 = vmatprep.mubr.msk.f32.mxu0 %vm672_vm1, %v972_v51  ;;  %v2004_v51 = vld [vmem:[%s2902_s7 + $0x48] sm:$0xff] }
 0x2b0   : > { %2228 = vmatmul.mubr.msk.f32.gmra.mrb[18].mxu0 %vm672_vm1, %v973_v62  ;;  %v2358_v46 = vpack.c.bf16 %v2004_v51, %v2003_v19  ;;  %v1593_v19 = vld [vmem:[%s2904_s9 + $0x18] sm:$0xff] }
 0x2b1   : > { %2357 = vmatpush3.bf16.msra.mxu0 %v2354_v4 }
 0x2b2   : > { %2359 = vmatprep.subr.bf16.mxu1 %v2358_v46 }
 0x377   : > { %v2220_v24 = vpop.f32.mrb[12].mxu0 }
 0x378   : > { %v1083_v25 = vadd.f32 %v2220_v24, %v1966_v23  ;;  %v1077_v26 = vpop.f32.mrb[13].mxu0 }
 0x379   : > { %v1078_v27 = vadd.f32 %v1966_v23, %v1077_v26 }
 0x37a   : > { %v1117_v31 = vmax.f32 %v1083_v25, 0.0 }
 0x37b   : > { %v1116_v28 = vmax.f32 %v1078_v27, 0.0  ;;  %v2223_v29 = vpop.f32.mrb[14].mxu0 }
 0x37c   : > { %v1093_v33 = vadd.f32 %v2223_v29, %v1966_v23  ;;  %v1087_v34 = vpop.f32.mrb[15].mxu0 }
 0x37d   : > { %v1088_v35 = vadd.f32 %v1966_v23, %v1087_v34  ;;  %2238 = vmatprep.mubr.msk.f32.mxu1 %vm672_vm1, %v1116_v28 }
 0x37e   : > { %2239 = vmatmul.mubr.msk.f32.vlgmr.msra.gmra.mrb[20].mxu1 %vm672_vm1, %v1117_v31  ;;  %v1119_v40 = vmax.f32 %v1093_v33, 0.0 }
 0x37f   : > { %v1118_v36 = vmax.f32 %v1088_v35, 0.0  ;;  %v2226_v38 = vpop.f32.mrb[16].mxu0  ;;  %2361 = vmatpush3.bf16.msra.mxu1 %v2358_v46 }
 0x380   : > { %v1103_v42 = vadd.f32 %v2226_v38, %v1966_v23  ;;  %v1097_v43 = vpop.f32.mrb[17].mxu0 }
 0x381   : > { %v1098_v44 = vadd.f32 %v1966_v23, %v1097_v43  ;;  %2241 = vmatprep.mubr.msk.f32.mxu1 %vm672_vm1, %v1118_v36 }
 0x382   : > { %2242 = vmatmul.mubr.msk.f32.gmra.mrb[22].mxu1 %vm672_vm1, %v1119_v40  ;;  %v1121_v52 = vmax.f32 %v1103_v42, 0.0  ;;  %v1994_v42 = vld [vmem:[%s2901_s6 + $0x2] ss:$0 sm:$0xff] }
 0x383   : > { %v1120_v45 = vmax.f32 %v1098_v44, 0.0  ;;  %v2229_v49 = vpop.f32.mrb[18].mxu0 }
 0x384   : > { %v1113_v54 = vadd.f32 %v2229_v49, %v1966_v23  ;;  %v1107_v55 = vpop.f32.mrb[19].mxu0 }
 0x385   : > { %v1108_v1 = vadd.f32 %v1966_v23, %v1107_v55  ;;  %2244 = vmatprep.mubr.msk.f32.mxu1 %vm672_vm1, %v1120_v45 }
 0x386   : > { %2245 = vmatmul.mubr.msk.f32.gmra.mrb[24].mxu1 %vm672_vm1, %v1121_v52  ;;  %v1123_v57 = vmax.f32 %v1113_v54, 0.0 }
 0x387   : > { %v1122_v56 = vmax.f32 %v1108_v1, 0.0 }
 0x389   : > { %2247 = vmatprep.mubr.msk.f32.mxu1 %vm672_vm1, %v1122_v56 }
 0x38a   : > { %2248 = vmatmul.mubr.msk.f32.gmra.mrb[26].mxu1 %vm672_vm1, %v1123_v57 }
 0x451   : > { %v2240_v7 = vpop.f32.mrb[20].mxu1 }
 0x452   : > { %v1233_v39 = vadd.f32 %v2240_v7, %v1980_v6  ;;  %v1227_v59 = vpop.f32.mrb[21].mxu1 }
 0x453   : > { %v1228_v41 = vadd.f32 %v1980_v6, %v1227_v59 }
 0x454   : > { %v2725_v9 = vadd.f32 %v1233_v39, %v2635_v53 }
 0x455   : > { %v2728_v11 = vadd.f32 %v1228_v41, %v2638_v0  ;;  %v2243_v12 = vpop.f32.mrb[22].mxu1 }
 0x456   : > { %v1243_v14 = vadd.f32 %v2243_v12, %v1980_v6  ;;  %1740 = vrot.lane.b32.xlu0 %v2725_v9, %s2397_s22  ;;  %v1237_v60 = vpop.f32.mrb[23].mxu1  ;;  %v1275_v17 = vmax.f32 %v2725_v9, 0.0 }
 0x457   : > { %v1274_v15 = vmax.f32 %v2728_v11, 0.0  ;;  %v1238_v61 = vadd.f32 %v1980_v6, %v1237_v60 }
 0x458   : > { %v2734_v37 = vadd.f32 %v1243_v14, %v2651_v5  ;;  %v2005_v5 = vld [vmem:[%s2902_s7 + $0x50] sm:$0xff] }
 0x459   : > { %v2738_v53 = vadd.f32 %v1238_v61, %v2654_v58  ;;  %v2246_v0 = vpop.f32.mrb[24].mxu1  ;;  %2258 = vmatprep.mubr.msk.f32.mxu0 %vm672_vm1, %v1274_v15  ;;  %v2362_v24 = vpack.c.bf16 %v2006_v63, %v2005_v5  ;;  %v2008_v5 = vld [vmem:[%s2903_s8 + $0x2] ss:$0 sm:$0xff] }
 0x45a   : > { %v1253_v62 = vadd.f32 %v2246_v0, %v1980_v6  ;;  %1744 = vrot.lane.b32.xlu1 %v2734_v37, %s2397_s22  ;;  %v1247_v58 = vpop.f32.mrb[25].mxu1  ;;  %1738 = vrot.lane.b32.xlu0 %v2728_v11, %s2397_s22  ;;  %v1277_v25 = vmax.f32 %v2734_v37, 0.0  ;;  %v1592_v0 = vld [vmem:[%s2904_s9 + $0x10] sm:$0xff] }
 0x45b   : > { %v1276_v22 = vmax.f32 %v2738_v53, 0.0  ;;  %v1248_v23 = vadd.f32 %v1980_v6, %v1247_v58  ;;  %2259 = vmatmul.mubr.msk.f32.vlgmr.msra.gmra.mrb[20].mxu0 %vm672_vm1, %v1275_v17  ;;  %2363 = vmatprep.subr.bf16.mxu1 %v2362_v24  ;;  %v2370_v51 = vpack.c.bf16 %v1593_v19, %v1592_v0 }
 0x45c   : > { %v2761_v26 = vadd.f32 %v1253_v62, %v2669_v13  ;;  %2365 = vmatpush3.bf16.msra.mxu1 %v2362_v24 }
 0x45d   : > { %v2764_v27 = vadd.f32 %v1248_v23, %v2672_v48  ;;  %v2249_v28 = vpop.f32.mrb[26].mxu1  ;;  %2261 = vmatprep.mubr.msk.f32.mxu0 %vm672_vm1, %v1276_v22 }
 0x45e   : > { %v1263_v29 = vadd.f32 %v2249_v28, %v1980_v6  ;;  %v1257_v31 = vpop.f32.mrb[27].mxu1  ;;  %1742 = vrot.lane.b32.xlu1 %v2738_v53, %s2397_s22  ;;  %v1279_v13 = vmax.f32 %v2761_v26, 0.0 }
 0x45f   : > { %v1278_v33 = vmax.f32 %v2764_v27, 0.0  ;;  %v1258_v34 = vadd.f32 %v1980_v6, %v1257_v31  ;;  %2262 = vmatmul.mubr.msk.f32.gmra.mrb[22].mxu0 %vm672_vm1, %v1277_v25  ;;  %1746 = vrot.lane.b32.xlu0 %v2764_v27, %s2397_s22 }
 0x460   : > { %v2775_v48 = vadd.f32 %v1263_v29, %v2687_v20  ;;  %v1590_v20 = vld [vmem:[%s2904_s9] sm:$0xff] }
 0x461   : > { %v2778_v35 = vadd.f32 %v1258_v34, %v2690_v21  ;;  %2264 = vmatprep.mubr.msk.f32.mxu0 %vm672_vm1, %v1278_v33  ;;  %v1591_v21 = vld [vmem:[%s2904_s9 + $0x8] sm:$0xff] }
 0x462   : > { %1748 = vrot.lane.b32.xlu1 %v2761_v26, %s2397_s22  ;;  %v1281_v38 = vmax.f32 %v2775_v48, 0.0  ;;  %v2366_v40 = vpack.c.bf16 %v1591_v21, %v1590_v20 }
 0x463   : > { %v1280_v36 = vmax.f32 %v2778_v35, 0.0  ;;  %2265 = vmatmul.mubr.msk.f32.gmra.mrb[24].mxu0 %vm672_vm1, %v1279_v13  ;;  %1750 = vrot.lane.b32.xlu0 %v2778_v35, %s2397_s22 }
 0x464   : > { %2367 = vmatprep.subr.bf16.mxu0 %v2366_v40 }
 0x465   : > { %2267 = vmatprep.mubr.msk.f32.mxu0 %vm672_vm1, %v1280_v36  ;;  %2369 = vmatpush3.bf16.msra.mxu0 %v2366_v40 }
 0x466   : > { %1752 = vrot.lane.b32.xlu1 %v2775_v48, %s2397_s22  ;;  %2371 = vmatprep.subr.bf16.mxu0 %v2370_v51 }
 0x467   : > { %2268 = vmatmul.mubr.msk.f32.gmra.mrb[26].mxu0 %vm672_vm1, %v1281_v38 }
 0x469   : > { %2373 = vmatpush3.bf16.msra.mxu0 %v2370_v51 }
 0x52e   : > { %v2260_v43 = vpop.f32.mrb[20].mxu0 }
 0x52f   : > { %v1391_v44 = vadd.f32 %v2260_v43, %v1994_v42  ;;  %v1385_v45 = vpop.f32.mrb[21].mxu0 }
 0x530   : > { %v1386_v49 = vadd.f32 %v1994_v42, %v1385_v45 }
 0x531   : > { %v1425_v55 = vmax.f32 %v1391_v44, 0.0 }
 0x532   : > { %v1424_v52 = vmax.f32 %v1386_v49, 0.0  ;;  %v2263_v54 = vpop.f32.mrb[22].mxu0 }
 0x533   : > { %v1401_v1 = vadd.f32 %v2263_v54, %v1994_v42  ;;  %v1395_v56 = vpop.f32.mrb[23].mxu0 }
 0x534   : > { %v1396_v57 = vadd.f32 %v1994_v42, %v1395_v56  ;;  %2278 = vmatprep.mubr.msk.f32.mxu1 %vm672_vm1, %v1424_v52 }
 0x535   : > { %2279 = vmatmul.mubr.msk.f32.vlgmr.msra.gmra.mrb[28].mxu1 %vm672_vm1, %v1425_v55  ;;  %v1427_v4 = vmax.f32 %v1401_v1, 0.0 }
 0x536   : > { %v1426_v32 = vmax.f32 %v1396_v57, 0.0  ;;  %v2266_v3 = vpop.f32.mrb[24].mxu0 }
 0x537   : > { %v1411_v6 = vadd.f32 %v2266_v3, %v1994_v42  ;;  %v1405_v7 = vpop.f32.mrb[25].mxu0 }
 0x538   : > { %v1406_v39 = vadd.f32 %v1994_v42, %v1405_v7  ;;  %2281 = vmatprep.mubr.msk.f32.mxu1 %vm672_vm1, %v1426_v32 }
 0x539   : > { %2282 = vmatmul.mubr.msk.f32.gmra.mrb[30].mxu1 %vm672_vm1, %v1427_v4  ;;  %v1429_v12 = vmax.f32 %v1411_v6, 0.0 }
 0x53a   : > { %v1428_v59 = vmax.f32 %v1406_v39, 0.0  ;;  %v2269_v41 = vpop.f32.mrb[26].mxu0 }
 0x53b   : > { %v1421_v14 = vadd.f32 %v2269_v41, %v1994_v42  ;;  %v1415_v60 = vpop.f32.mrb[27].mxu0 }
 0x53c   : > { %v1416_v15 = vadd.f32 %v1994_v42, %v1415_v60  ;;  %2284 = vmatprep.mubr.msk.f32.mxu1 %vm672_vm1, %v1428_v59 }
 0x53d   : > { %2285 = vmatmul.mubr.msk.f32.gmra.mrb[32].mxu1 %vm672_vm1, %v1429_v12  ;;  %v1431_v17 = vmax.f32 %v1421_v14, 0.0 }
 0x53e   : > { %v1430_v61 = vmax.f32 %v1416_v15, 0.0  ;;  %v1745_v15 = vpop.permute.xlu1 %1744 }
 0x540   : > { %2287 = vmatprep.mubr.msk.f32.mxu1 %vm672_vm1, %v1430_v61  ;;  %v1741_v61 = vpop.permute.xlu0 %1740 }
 0x541   : > { %2288 = vmatmul.mubr.msk.f32.gmra.mrb[34].mxu1 %vm672_vm1, %v1431_v17 }
 0x542   : > { %v1743_v17 = vpop.permute.xlu1 %1742 }
 0x544   : > { %v1739_v0 = vpop.permute.xlu0 %1738 }
 0x546   : > { %v1749_v19 = vpop.permute.xlu1 %1748 }
 0x548   : > { %v1747_v51 = vpop.permute.xlu0 %1746 }
 0x608   : > { %v2280_v62 = vpop.f32.mrb[28].mxu1 }
 0x609   : > { %v1541_v58 = vadd.f32 %v2280_v62, %v2008_v5  ;;  %v1535_v46 = vpop.f32.mrb[29].mxu1  ;;  %v1751_v62 = vpop.permute.xlu0 %1750 }
 0x60a   : > { %v1536_v63 = vadd.f32 %v2008_v5, %v1535_v46 }
 0x60b   : > { %v1575_v22 = vadd.f32 %v1541_v58, %v2725_v9 }
 0x60c   : > { %v1574_v23 = vadd.f32 %v1536_v63, %v2728_v11  ;;  %v2283_v24 = vpop.f32.mrb[30].mxu1 }
 0x60d   : > { %v1551_v25 = vadd.f32 %v2283_v24, %v2008_v5  ;;  %1772 = vrot.lane.b32.xlu1 %v1575_v22, %s2398_s28  ;;  %v1545_v28 = vpop.f32.mrb[31].mxu1  ;;  %v1583_v33 = vmax.f32 %v1575_v22, 0.0 }
 0x60e   : > { %v1582_v29 = vmax.f32 %v1574_v23, 0.0  ;;  %v1546_v31 = vadd.f32 %v2008_v5, %v1545_v28  ;;  %1770 = vrot.lane.b32.xlu0 %v1574_v23, %s2398_s28 }
 0x60f   : > { %v1577_v34 = vadd.f32 %v1551_v25, %v2734_v37 }
 0x610   : > { %v1576_v13 = vadd.f32 %v1546_v31, %v2738_v53  ;;  %v2286_v36 = vpop.f32.mrb[32].mxu1  ;;  %2298 = vmatprep.mubr.msk.f32.mxu0 %vm672_vm1, %v1582_v29  ;;  %v1827_v29 = vsel %vm672_vm1, %v2628_v47, %v1741_v61  ;;  %v1826_v31 = vsel %vm672_vm1, %v2632_v50, %v1739_v0  ;;  %v1828_v47 = vsel %vm672_vm1, %v2647_v2, %v1743_v17 }
 0x611   : > { %v1561_v9 = vadd.f32 %v2286_v36, %v2008_v5  ;;  %1776 = vrot.lane.b32.xlu1 %v1577_v34, %s2398_s28  ;;  %v1555_v11 = vpop.f32.mrb[33].mxu1  ;;  %2299 = vmatmul.mubr.msk.f32.vlgmr.msra.gmra.mrb[28].mxu0 %vm672_vm1, %v1583_v33  ;;  %v1585_v21 = vmax.f32 %v1577_v34, 0.0  ;;  %v1830_v2 = vsel %vm672_vm1, %v2665_v10, %v1747_v51  ;;  %v1832_v10 = vsel %vm672_vm1, %v2683_v18, %v1751_v62 }
 0x612   : > { %v1584_v38 = vmax.f32 %v1576_v13, 0.0  ;;  %v1556_v20 = vadd.f32 %v2008_v5, %v1555_v11  ;;  %1774 = vrot.lane.b32.xlu0 %v1576_v13, %s2398_s28 }
 0x613   : > { %v1579_v40 = vadd.f32 %v1561_v9, %v2761_v26 }
 0x614   : > { %v1578_v37 = vadd.f32 %v1556_v20, %v2764_v27  ;;  %v2289_v42 = vpop.f32.mrb[34].mxu1  ;;  %2301 = vmatprep.mubr.msk.f32.mxu0 %vm672_vm1, %v1584_v38  ;;  %v1829_v38 = vsel %vm672_vm1, %v2642_v30, %v1745_v15  ;;  %v1831_v30 = vsel %vm672_vm1, %v2659_v8, %v1749_v19 }
 0x615   : > { %v1571_v53 = vadd.f32 %v2289_v42, %v2008_v5  ;;  %1780 = vrot.lane.b32.xlu1 %v1579_v40, %s2398_s28  ;;  %v1565_v43 = vpop.f32.mrb[35].mxu1  ;;  %2302 = vmatmul.mubr.msk.f32.gmra.mrb[30].mxu0 %vm672_vm1, %v1585_v21  ;;  %v1587_v49 = vmax.f32 %v1579_v40, 0.0 }
 0x616   : > { %v1586_v44 = vmax.f32 %v1578_v37, 0.0  ;;  %v1566_v45 = vadd.f32 %v2008_v5, %v1565_v43  ;;  %1778 = vrot.lane.b32.xlu0 %v1578_v37, %s2398_s28  ;;  %v1753_v5 = vpop.permute.xlu1 %1752 }
 0x617   : > { %v1581_v52 = vadd.f32 %v1571_v53, %v2775_v48  ;;  %v2017_v48 = vld [vmem:[%s2905_s10] ss:$0 sm:$0xff]  ;;  %v1833_v8 = vsel %vm672_vm1, %v2677_v16, %v1753_v5 }
 0x618   : > { %v1580_v26 = vadd.f32 %v1566_v45, %v2778_v35  ;;  %2304 = vmatprep.mubr.msk.f32.mxu0 %vm672_vm1, %v1586_v44 }
 0x619   : > { %1784 = vrot.lane.b32.xlu1 %v1581_v52, %s2398_s28  ;;  %2305 = vmatmul.mubr.msk.f32.gmra.mrb[32].mxu0 %vm672_vm1, %v1587_v49  ;;  %v1589_v54 = vmax.f32 %v1581_v52, 0.0 }
 0x61a   : > { %v1588_v27 = vmax.f32 %v1580_v26, 0.0  ;;  %1782 = vrot.lane.b32.xlu0 %v1580_v26, %s2398_s28 }
 0x61c   : > { %2307 = vmatprep.mubr.msk.f32.mxu0 %vm672_vm1, %v1588_v27 }
 0x61d   : > { %2308 = vmatmul.mubr.msk.f32.gmra.mrb[34].mxu0 %vm672_vm1, %v1589_v54 }
 0x67f   : > { %v1773_v58 = vpop.permute.xlu1 %1772 }
 0x680   : > { %v1771_v46 = vpop.permute.xlu0 %1770  ;;  %v1836_v33 = vsel %vm1834_vm2, %v1827_v29, %v1773_v58 }
 0x681   : > { %v1835_v13 = vsel %vm1834_vm2, %v1826_v31, %v1771_v46 }
 0x683   : > { %v1777_v63 = vpop.permute.xlu1 %1776 }
 0x684   : > { %v1775_v22 = vpop.permute.xlu0 %1774  ;;  %v1838_v50 = vsel %vm1834_vm2, %v1829_v38, %v1777_v63 }
 0x685   : > { %v1837_v21 = vsel %vm1834_vm2, %v1828_v47, %v1775_v22 }
 0x687   : > { %v1781_v23 = vpop.permute.xlu1 %1780 }
 0x688   : > { %v1779_v24 = vpop.permute.xlu0 %1778  ;;  %v1840_v53 = vsel %vm1834_vm2, %v1831_v30, %v1781_v23 }
 0x689   : > { %v1839_v44 = vsel %vm1834_vm2, %v1830_v2, %v1779_v24 }
 0x68b   : > { %v1785_v25 = vpop.permute.xlu1 %1784 }
 0x68c   : > { %v1783_v28 = vpop.permute.xlu0 %1782  ;;  %v1842_v26 = vsel %vm1834_vm2, %v1833_v8, %v1785_v25 }
 0x68d   : > { %v1841_v54 = vsel %vm1834_vm2, %v1832_v10, %v1783_v28 }
 0x6e4   : > { %v2300_v55 = vpop.f32.mrb[28].mxu0 }
 0x6e5   : > { %v1697_v35 = vadd.f32 %v2300_v55, %v2017_v48  ;;  %v1691_v1 = vpop.f32.mrb[29].mxu0 }
 0x6e6   : > { %v1692_v56 = vadd.f32 %v2017_v48, %v1691_v1 }
 0x6e7   : > { %1804 = vrot.lane.b32.xlu1 %v1697_v35, %s2399_s13 }
 0x6e8   : > { %v2303_v57 = vpop.f32.mrb[30].mxu0  ;;  %1802 = vrot.lane.b32.xlu0 %v1692_v56, %s2399_s13 }
 0x6e9   : > { %v1707_v32 = vadd.f32 %v2303_v57, %v2017_v48  ;;  %v1701_v3 = vpop.f32.mrb[31].mxu0 }
 0x6ea   : > { %v1702_v4 = vadd.f32 %v2017_v48, %v1701_v3 }
 0x6eb   : > { %1808 = vrot.lane.b32.xlu1 %v1707_v32, %s2399_s13 }
 0x6ec   : > { %v2306_v6 = vpop.f32.mrb[32].mxu0  ;;  %1806 = vrot.lane.b32.xlu0 %v1702_v4, %s2399_s13 }
 0x6ed   : > { %v1717_v7 = vadd.f32 %v2306_v6, %v2017_v48  ;;  %v1711_v39 = vpop.f32.mrb[33].mxu0 }
 0x6ee   : > { %v1712_v59 = vadd.f32 %v2017_v48, %v1711_v39 }
 0x6ef   : > { %1812 = vrot.lane.b32.xlu1 %v1717_v7, %s2399_s13 }
 0x6f0   : > { %v2309_v41 = vpop.f32.mrb[34].mxu0  ;;  %1810 = vrot.lane.b32.xlu0 %v1712_v59, %s2399_s13 }
 0x6f1   : > { %v1727_v12 = vadd.f32 %v2309_v41, %v2017_v48  ;;  %v1721_v14 = vpop.f32.mrb[35].mxu0 }
 0x6f2   : > { %v1722_v60 = vadd.f32 %v2017_v48, %v1721_v14 }
 0x6f3   : > { %1816 = vrot.lane.b32.xlu1 %v1727_v12, %s2399_s13 }
 0x6f4   : > { %1814 = vrot.lane.b32.xlu0 %v1722_v60, %s2399_s13 }
 0x759   : > { %v1805_v34 = vpop.permute.xlu1 %1804 }
 0x75a   : > { %v1845_v36 = vsel %vm1843_vm3, %v1836_v33, %v1805_v34  ;;  %v1803_v9 = vpop.permute.xlu0 %1802 }
 0x75b   : > { %1853 = vst [vmem:[%s2850_s16 + $0x8] sm:$0xff] %v1845_v36  ;;  %v1844_v11 = vsel %vm1843_vm3, %v1835_v13, %v1803_v9 }
 0x75c   : > { %1852 = vst [vmem:[%s2850_s16] sm:$0xff] %v1844_v11 }
 0x75d   : > { %v1809_v20 = vpop.permute.xlu1 %1808 }
 0x75e   : > { %v1847_v40 = vsel %vm1843_vm3, %v1838_v50, %v1809_v20  ;;  %v1807_v37 = vpop.permute.xlu0 %1806 }
 0x75f   : > { %1855 = vst [vmem:[%s2850_s16 + $0x18] sm:$0xff] %v1847_v40  ;;  %v1846_v42 = vsel %vm1843_vm3, %v1837_v21, %v1807_v37 }
 0x760   : > { %1854 = vst [vmem:[%s2850_s16 + $0x10] sm:$0xff] %v1846_v42 }
 0x761   : > { %v1813_v43 = vpop.permute.xlu1 %1812 }
 0x762   : > { %v1849_v45 = vsel %vm1843_vm3, %v1840_v53, %v1813_v43  ;;  %v1811_v49 = vpop.permute.xlu0 %1810 }
 0x763   : > { %1857 = vst [vmem:[%s2850_s16 + $0x28] sm:$0xff] %v1849_v45  ;;  %v1848_v52 = vsel %vm1843_vm3, %v1839_v44, %v1811_v49 }
 0x764   : > { %1856 = vst [vmem:[%s2850_s16 + $0x20] sm:$0xff] %v1848_v52 }
 0x765   : > { %v1817_v27 = vpop.permute.xlu1 %1816 }
 0x766   : > { %v1851_v48 = vsel %vm1843_vm3, %v1842_v26, %v1817_v27  ;;  %v1815_v55 = vpop.permute.xlu0 %1814 }
 0x767   : > { %1859 = vst [vmem:[%s2850_s16 + $0x38] sm:$0xff] %v1851_v48  ;;  %v1850_v35 = vsel %vm1843_vm3, %v1841_v54, %v1815_v55 }
 0x768   : > { %1858 = vst [vmem:[%s2850_s16 + $0x30] sm:$0xff] %v1850_v35 }
 0x769 PF: > { %s21_s17 = sadd.s32 1, %s2395_s17  }
 0x76a   : > { %p18_p4 = scmp.ge.s32.totalorder %s21_s17, 4  }
 0x76c   :  { %20 = sbr.rel (!%p18_p4) target bundleno = 1 (0x1), region = 102 }

</bundles_post_ra>
